<compile_context>
chip_gen: v6e
topology: v6e:2x2x1
jax: 0.10.0
libtpu: 0.0.40
codegen_flags: <defaults>
</compile_context>

<pallas_src>
import jax
import jax.numpy as jnp
from jax import lax
from jax.experimental import pallas as pl
from jax.experimental.pallas import tpu as pltpu


# Chunk counts at or below this are unrolled in Python (full scheduler visibility);
# larger counts use a lax.fori_loop so program size stays bounded.
_UNROLL_CHUNKS = 4


def coop_fill_ctx(prompt_template, ctx, *, block_classes=None):
    """In-place CoOp forward.

    prompt_template: (n_cls, seq, D) frozen token embeddings of the tokenized prompts
        (rows [:1] = prefix, rows [1+n_ctx:] = suffix; the n_ctx rows in between are
        placeholders and get overwritten).
    ctx: (n_ctx, D) learned context vectors (shared across classes, CSC=False).

    Returns (n_cls, seq, D) == concat([prefix, broadcast(ctx), suffix], axis=1).
    The output aliases `prompt_template` (donate it for a true in-place update).
    """
    n_cls, seq, D = prompt_template.shape
    n_ctx, D2 = ctx.shape
    assert D2 == D, "ctx_dim mismatch"
    assert seq > n_ctx + 1, "sequence must hold SOS + ctx + class tokens"

    itemsize = jnp.dtype(prompt_template.dtype).itemsize
    # Mosaic pads the last two dims of a VMEM array to (sublane, 128) tiles; the
    # sublane tile is 8 for 32-bit, 16 for 16-bit, 32 for 8-bit dtypes.
    sublane = max(8, 32 // itemsize)
    padded_plane_bytes = (
        (-(-n_ctx // sublane) * sublane) * (-(-D // 128) * 128) * itemsize)

    if block_classes is None:
        # ~2 MiB scratch chunks: big enough that per-DMA overhead is <1%, small
        # enough that the one-time broadcast fill is invisible; bandwidth comes from
        # keeping two chunk DMAs in flight, not from one huge chunk.
        target_bytes = 2 * 1024 * 1024
        block_classes = max(1, target_bytes // padded_plane_bytes)
    # Guardrail: never exceed n_cls (would produce an out-of-bounds HBM window).
    block_classes = int(max(1, min(int(block_classes), n_cls)))

    num_chunks = -(-n_cls // block_classes)
    tail = n_cls - (num_chunks - 1) * block_classes      # in [1, block_classes]
    if tail == block_classes:
        full_chunks, tail_classes = num_chunks, 0        # every chunk is full-size
    else:
        full_chunks, tail_classes = num_chunks - 1, tail  # exact-size last chunk

    def kernel(emb_hbm_ref, ctx_ref, out_hbm_ref, ctx_blk, sems):
        del emb_hbm_ref  # Same HBM buffer as out_hbm_ref (aliased); never read here.

        # One-time broadcast of the shared ctx across the class axis of the scratch.
        ctx_blk[...] = jnp.broadcast_to(
            ctx_ref[...].astype(ctx_blk.dtype)[None], ctx_blk.shape)

        def full_copy(start, slot):
            return pltpu.make_async_copy(
                ctx_blk,
                out_hbm_ref.at[pl.ds(start, block_classes), pl.ds(1, n_ctx), :],
                sems.at[slot])

        def tail_copy(start, slot):
            return pltpu.make_async_copy(
                ctx_blk.at[pl.ds(0, tail_classes)],
                out_hbm_ref.at[pl.ds(start, tail_classes), pl.ds(1, n_ctx), :],
                sems.at[slot])

        # --- Full-size chunks, keeping two DMAs in flight (2-slot sem ring). ------
        if full_chunks > 0:
            if full_chunks <= _UNROLL_CHUNKS:
                for c in range(full_chunks):          # static unroll
                    slot = c & 1
                    if c >= 2:
                        # Chunk c-2 used this slot with the same transfer size.
                        full_copy(0, slot).wait()
                    full_copy(c * block_classes, slot).start()
            else:
                def body(c, carry):
                    slot = c & 1

                    @pl.when(c >= 2)
                    def _():
                        # Chunk c-2 used this slot with the same transfer size.
                        full_copy(0, slot).wait()

                    full_copy(c * block_classes, slot).start()
                    return carry

                lax.fori_loop(0, full_chunks, body, 0)

        # --- Exact-size tail chunk: disjoint HBM window, so it may be in flight ----
        # together with chunk full_chunks-1; only its sem slot must be drained first.
        if tail_classes > 0:
            slot = full_chunks & 1
            if full_chunks >= 2:
                full_copy(0, slot).wait()             # chunk full_chunks-2
            tail_copy(full_chunks * block_classes, slot).start()

        # --- Drain the (up to two) copies still in flight, oldest first. -----------
        if num_chunks >= 2:
            full_copy(0, (num_chunks - 2) & 1).wait()  # chunk num_chunks-2 (full)
        if tail_classes > 0:
            tail_copy(0, (num_chunks - 1) & 1).wait()  # last chunk (tail-size)
        else:
            full_copy(0, (num_chunks - 1) & 1).wait()  # last chunk (full-size)

    return pl.pallas_call(
        kernel,
        out_shape=jax.ShapeDtypeStruct(prompt_template.shape, prompt_template.dtype),
        grid=(1,),
        in_specs=[
            pl.BlockSpec(memory_space=pl.ANY),             # template stays in HBM
            pl.BlockSpec((n_ctx, D), lambda i: (0, 0)),    # ctx resident in VMEM
        ],
        out_specs=pl.BlockSpec(memory_space=pl.ANY),       # aliased HBM output
        scratch_shapes=[
            pltpu.VMEM((block_classes, n_ctx, D), prompt_template.dtype),
            pltpu.SemaphoreType.DMA((2,)),                 # 2-deep DMA ring
        ],
        input_output_aliases={0: 0},                       # output == template buffer
        compiler_params=pltpu.CompilerParams(
            dimension_semantics=("arbitrary",),
        ),
    )(prompt_template, ctx)


def build_prompt_template(prefix, suffix, n_ctx):
    """Init-time helper (register_buffer equivalent): build the (n_cls, seq, D)
    template from the module's prefix/suffix buffers, with zero placeholders in the
    ctx rows.  Done once; every forward pass only rewrites the ctx rows in-kernel."""
    n_cls, one, D = prefix.shape
    assert one == 1
    placeholder = jnp.zeros((n_cls, n_ctx, D), dtype=prefix.dtype)
    return jnp.concatenate([prefix, placeholder, suffix], axis=1)


if __name__ == "__main__":
    # Small deterministic setup consistent with the module:
    #   n_cls classes, n_ctx learned context tokens, ctx_dim embedding dim,
    #   seq = 1 (SOS) + n_ctx + suffix_len.
    n_cls = 8
    n_ctx = 4
    ctx_dim = 128
    suffix_len = 11          # class-name tokens + EOS + padding
    param_std = 0.02         # cfg.TRAIN.PARAM_STD
    total_seq = 1 + n_ctx + suffix_len

    key = jax.random.PRNGKey(0)
    k_ctx, k_emb = jax.random.split(key)

    # Learned context vectors: nn.init.normal_(ctx_vectors, std=PARAM_STD).
    ctx = (param_std * jax.random.normal(k_ctx, (n_ctx, ctx_dim))).astype(jnp.float32)

    # Frozen token embeddings of the tokenized prompts (synthetic stand-in for
    # CLIP's token_embedding output); the module registers these two slices.
    token_emb = jax.random.normal(
        k_emb, (n_cls, total_seq, ctx_dim)).astype(jnp.float32)
    prefix = token_emb[:, :1, :]
    suffix = token_emb[:, 1 + n_ctx:, :]

    # Pure-JAX reference of the PyTorch forward.
    ctx_expanded = jnp.broadcast_to(ctx[None, :, :], (n_cls, n_ctx, ctx_dim))
    ref = jax.block_until_ready(
        jnp.concatenate([prefix, ctx_expanded, suffix], axis=1))

    # Forward: in-place ctx update of the donated template (production call pattern).
    forward = jax.jit(coop_fill_ctx, static_argnames=("block_classes",),
                      donate_argnums=0)

    # Case 1: default chunking (single full-size chunk here).
    template = jax.block_until_ready(build_prompt_template(prefix, suffix, n_ctx))
    out = jax.block_until_ready(forward(template, ctx))
    assert out.shape == (n_cls, total_seq, ctx_dim)
    assert bool(jnp.array_equal(out, ref)), "mismatch vs reference (default chunking)"

    # Case 2: multi-chunk path with an exact-size tail (exercises the 2-deep ring
    # plus the tail handling: 3 + 3 + 2 classes).
    template2 = jax.block_until_ready(build_prompt_template(prefix, suffix, n_ctx))
    out2 = jax.block_until_ready(forward(template2, ctx, block_classes=3))
    assert bool(jnp.array_equal(out2, ref)), "mismatch vs reference (multi-chunk/tail)"

    # Case 3: many chunks (exercises the dynamic fori_loop issue path, 8 x 1 class).
    template3 = jax.block_until_ready(build_prompt_template(prefix, suffix, n_ctx))
    out3 = jax.block_until_ready(forward(template3, ctx, block_classes=1))
    assert bool(jnp.array_equal(out3, ref)), "mismatch vs reference (dynamic loop)"

    print("KERNEL_OK")
</pallas_src>

<mosaic_0001>
module attributes {stable_mosaic.version = 11 : i64} {
  func.func @kernel(%arg0: i32, %arg1: memref<8x16x128xf32, #tpu.memory_space<any>>, %arg2: memref<4x128xf32, #tpu.memory_space<vmem>>, %arg3: memref<8x16x128xf32, #tpu.memory_space<any>>, %arg4: memref<8x4x128xf32, #tpu.memory_space<vmem>>, %arg5: memref<2x!tpu.dma_semaphore, #tpu.memory_space<semaphore_mem>>) attributes {dimension_semantics = [#tpu.dimension_semantics<arbitrary>], iteration_bounds = array<i64: 1>, scalar_prefetch = 0 : i64, scratch_operands = 2 : i64, tpu.core_type = #tpu.core_type<tc>, window_params = [{}, {pipeline_mode = #tpu.pipeline_mode<synchronous>, transform_indices = @transform_1, window_bounds = array<i64: 4, 128>}, {}]} {
    %c0 = arith.constant 0 : index
    %c0_0 = arith.constant 0 : index
    %0 = vector.load %arg2[%c0, %c0_0] : memref<4x128xf32, #tpu.memory_space<vmem>>, vector<4x128xf32>
    %1 = vector.shape_cast %0 : vector<4x128xf32> to vector<1x4x128xf32>
    %2 = vector.shape_cast %1 : vector<1x4x128xf32> to vector<1x4x128xf32>
    %3 = vector.broadcast %2 : vector<1x4x128xf32> to vector<8x4x128xf32>
    %c0_1 = arith.constant 0 : index
    %c0_2 = arith.constant 0 : index
    %c0_3 = arith.constant 0 : index
    %4 = vector.load %arg4[%c0_1, %c0_2, %c0_3] : memref<8x4x128xf32, #tpu.memory_space<vmem>>, vector<8x4x128xf32>
    tpu.vector_store %arg4[%c0_1, %c0_2, %c0_3], %3 {strides = array<i32>} : memref<8x4x128xf32, #tpu.memory_space<vmem>>, vector<8x4x128xf32>,
    %c0_i32 = arith.constant 0 : i32
    %c0_i32_4 = arith.constant 0 : i32
    %c1_i32 = arith.constant 1 : i32
    %c0_i32_5 = arith.constant 0 : i32
    %5 = tpu.memref_slice %arg3[%c0_i32_4, %c1_i32, %c0_i32_5] : memref<8x16x128xf32, #tpu.memory_space<any>> -> memref<8x4x128xf32, #tpu.memory_space<any>>
    %6 = tpu.memref_slice %arg5[%c0_i32] : memref<2x!tpu.dma_semaphore, #tpu.memory_space<semaphore_mem>> -> memref<1x!tpu.dma_semaphore, #tpu.memory_space<semaphore_mem>>
    %7 = tpu.memref_squeeze %6 : memref<1x!tpu.dma_semaphore, #tpu.memory_space<semaphore_mem>> -> memref<!tpu.dma_semaphore, #tpu.memory_space<semaphore_mem>>
    tpu.enqueue_dma source(%arg4 : memref<8x4x128xf32, #tpu.memory_space<vmem>>) target(%5 : memref<8x4x128xf32, #tpu.memory_space<any>>) target_semaphore(%7 : memref<!tpu.dma_semaphore, #tpu.memory_space<semaphore_mem>>)
    %c0_i32_6 = arith.constant 0 : i32
    %c0_i32_7 = arith.constant 0 : i32
    %c1_i32_8 = arith.constant 1 : i32
    %c0_i32_9 = arith.constant 0 : i32
    %8 = tpu.memref_slice %arg3[%c0_i32_7, %c1_i32_8, %c0_i32_9] : memref<8x16x128xf32, #tpu.memory_space<any>> -> memref<8x4x128xf32, #tpu.memory_space<any>>
    %9 = tpu.memref_slice %arg5[%c0_i32_6] : memref<2x!tpu.dma_semaphore, #tpu.memory_space<semaphore_mem>> -> memref<1x!tpu.dma_semaphore, #tpu.memory_space<semaphore_mem>>
    %10 = tpu.memref_squeeze %9 : memref<1x!tpu.dma_semaphore, #tpu.memory_space<semaphore_mem>> -> memref<!tpu.dma_semaphore, #tpu.memory_space<semaphore_mem>>
    tpu.wait_dma2 semaphore(%10 : memref<!tpu.dma_semaphore, #tpu.memory_space<semaphore_mem>>) src(%arg4 : memref<8x4x128xf32, #tpu.memory_space<vmem>>) dst(%8 : memref<8x4x128xf32, #tpu.memory_space<any>>)
    return
  }
  func.func @transform_1(%arg0: i32) -> (i32, i32) {
    %c0_i32 = arith.constant 0 : i32
    %c0_i32_0 = arith.constant 0 : i32
    %c0_i32_1 = arith.constant 0 : i32
    return %c0_i32, %c0_i32_0 : i32, i32
  }
}

</mosaic_0001>

<bundles_post_ra>
// kernel: coop_fill_ctx.1
= control target key start
LH: loop header
LB: loop body
LE: loop exit
PB: predicated region body
PF: predicated region fallthrough
CT: control target
= control target key end

     0   :  { %7 = vsyncpa [#allocation5], 0  ;;  %s108_s9 = smov [#allocation4]   ;;  %s134_s0 = inlined_call_operand.hbm [shape: f32[8,16,128], index: 0, kind: input, shape index: {}, may-alias: {0,2}]   ;;  %s135_s1 = inlined_call_operand.hbm [shape: f32[4,128], index: 1, kind: input, shape index: {}]   ;;  %s136_s2 = inlined_call_operand.hbm [shape: f32[8,16,128], index: 2, kind: output, shape index: {}, may-alias: {0,2}]  }
   0x1   :  { %s14_s10 = sshll.u32 %s108_s9, 4  ;;  %s15_s10 = int_to_ptr.vmem [resolvable:$true] %s14_s10 }
   0x2   :  { %s69_s11 = scalar_lea.vmem %s15_s10, 64  ;;  %p74_p1 = scmp.lt.s32.totalorder %s15_s10, %s15_s10 }
   0x3   :  { %p70_p0 = scmp.ne.s32.totalorder %s15_s10, %s69_s11  ;;  %p75_p2 = scmp.lt.s32.totalorder %s69_s11, %s69_s11 }
   0x5   :  { %p76_p3 = por %p75_p2, %p74_p1 }
   0x7   :  { %p77_p4 = pnand %p76_p3, %p70_p0 }
   0x9   :  { %80 = shalt.err (!%p77_p4)
}
   0xa   :  { %17 = dma.hbm_to_vmem [thread:$0]  %s135_s1, 64, %s15_s10, [#allocation5]  }
   0xb   :  { %104 = dma.done.wait [#allocation5], 64  }
   0xc   :  { %105 = vsyncadd [#allocation5], 4294967232  ;;  %s109_s0 = smov [#allocation2]   ;;  %s30_s17 = scalar_lea.hbm %s136_s2, 16  ;;  %v21_v0 = vld [vmem:[#allocation4] sm:$0xf] }
   0xd   :  { %s32_s14 = sshll.u32 %s109_s0, 4  ;;  %22 = vst [vmem:[#allocation2] sm:$0xf] %v21_v0  ;;  %23 = vst [vmem:[#allocation2 + $0x4] sm:$0xf] %v21_v0  ;;  %s33_s14 = int_to_ptr.vmem [resolvable:$true] %s32_s14 }
   0xe   :  { %24 = vst [vmem:[#allocation2 + $0x8] sm:$0xf] %v21_v0  ;;  %25 = vst [vmem:[#allocation2 + $0xc] sm:$0xf] %v21_v0  ;;  %s81_s18 = scalar_lea.vmem %s33_s14, 512  ;;  %p86_p6 = scmp.lt.s32.totalorder %s33_s14, %s33_s14 }
   0xf   :  { %26 = vst [vmem:[#allocation2 + $0x10] sm:$0xf] %v21_v0  ;;  %27 = vst [vmem:[#allocation2 + $0x14] sm:$0xf] %v21_v0  ;;  %p82_p5 = scmp.ne.s32.totalorder %s33_s14, %s81_s18  ;;  %p87_p7 = scmp.lt.s32.totalorder %s81_s18, %s81_s18 }
  0x10   :  { %28 = vst [vmem:[#allocation2 + $0x18] sm:$0xf] %v21_v0  ;;  %29 = vst [vmem:[#allocation2 + $0x1c] sm:$0xf] %v21_v0 }
  0x11   :  { %p88_p8 = por %p87_p7, %p86_p6 }
  0x13   :  { %p89_p9 = pnand %p88_p8, %p82_p5 }
  0x15   :  { %92 = shalt.err (!%p89_p9)  }
  0x16   :  { %s110_s1 = smov 64   ;;  %s111_s19 = smov 256  }
  0x17   :  { %s112_s2 = smov 4  }
  0x18   :  { %35 = dma.vmem_to_hbm [thread:$0]  %s33_s14, 512, %s30_s17, [#allocation3], %s110_s1, %s111_s19, %s112_s2 }
  0x19   :  { %106 = dma.done.wait [#allocation3], 512 }
  0x1a   :  { %107 = vsyncadd [#allocation3], 4294966784 }
  0x1b   :  { %40 = vsyncpa [#allocation5], 1 }
  0x1c   :  { %41 = vsyncmov [#allocation3] }
  0x1f   :  { %s42_s20 = vpop.sfrf %41 }
  0x20   :  { %p54_p10 = scmp.ne.s32.totalorder %s42_s20, 0 }
  0x22   :  { %46 = shalt.err (%p54_p10)  }
  0x23   :  { %48 = vsyncmov [#allocation3 + $0x1] }
  0x26   :  { %s49_s21 = vpop.sfrf %48 }
  0x27   :  { %p55_p11 = scmp.ne.s32.totalorder %s49_s21, 0 }
  0x29   :  { %53 = shalt.err (%p55_p11)  }

</bundles_post_ra>
